<compile_context>
chip_gen: v7x
topology: tpu7x:2x2x1
jax: 0.10.0
libtpu: 0.0.40
codegen_flags: <defaults>
</compile_context>

<pallas_src>
import jax
import jax.numpy as jnp
import numpy as np
from jax import lax
from jax.experimental import pallas as pl
from jax.experimental.pallas import tpu as pltpu


def _conv_split_kernel(w_ref, rhs_ref, o_ref):
    """Single fused matmul: (8, K) . (K, M) -> (8, M).

    w_ref   : (8, K)  weights for output channels 0/1 (rows 2..7 zero), K = 9*Cin + 1,
              last column holds the bias.
    rhs_ref : (K, M)  lane-dense im2col slab; last row is all-ones (bias row).
    o_ref   : (8, M)  row c = channel-c conv output, flattened (n, h, w) row-major.
    """
    o_ref[...] = lax.dot_general(
        w_ref[...], rhs_ref[...],
        dimension_numbers=(((1,), (0,)), ((), ())),
        preferred_element_type=jnp.float32,
        precision=lax.Precision.HIGHEST,
    ).astype(o_ref.dtype)


def conv2d_split_pallas(x_nchw, weight, bias):
    """Returns (y[:, 0:1], y[:, 1:2]) of conv2d(x) without computing channels 2..7.

    x_nchw : (N, Cin, H, W) float32
    weight : (Cout, Cin, 3, 3) float32   (PyTorch OIHW layout, Cout >= 2)
    bias   : (Cout,) float32

    Note: the weight/bias reshuffle below is a handful of ops on 296 floats; weights
    are static between calls, so under jit XLA constant-folds / fuses it. For a
    training loop with fixed params, hoist w_lhs construction out of the hot path.
    """
    N, Cin, H, W = x_nchw.shape
    Cout, _, Kh, Kw = weight.shape
    assert (Kh, Kw) == (3, 3), "LayerSplitModule's model is a 3x3 conv"
    M = N * H * W
    K = Kh * Kw * Cin + 1          # 9 taps * Cin channels + 1 bias row
    CP = 8                         # output channel axis padded to 8 sublanes

    # --- wrapper-side im2col: lane-dense (K, M) slab (M on the lane axis) ---
    xt = jnp.transpose(x_nchw, (1, 0, 2, 3))                     # (Cin, N, H, W)
    xt_p = jnp.pad(xt, ((0, 0), (0, 0), (1, 1), (1, 1)))         # (Cin, N, H+2, W+2)
    taps = []
    for dy in range(Kh):
        for dx in range(Kw):
            taps.append(xt_p[:, :, dy:dy + H, dx:dx + W].reshape(Cin, M))
    taps.append(jnp.ones((1, M), x_nchw.dtype))                  # bias row
    rhs = jnp.concatenate(taps, axis=0)                          # (K, M) = (37, 512)

    # --- weights for the 2 returned channels, as one lane-friendly LHS ---
    w2 = weight[:2]                                              # (2, Cin, 3, 3)
    w_lhs = jnp.transpose(w2, (0, 2, 3, 1)).reshape(2, Kh * Kw * Cin)   # (2, 36)
    w_lhs = jnp.concatenate([w_lhs, bias[:2].reshape(2, 1)], axis=1)    # (2, 37)
    w_lhs = jnp.pad(w_lhs, ((0, CP - 2), (0, 0)))                       # (8, 37)

    cost = pl.CostEstimate(
        flops=2 * CP * K * M,
        transcendentals=0,
        bytes_accessed=4 * (CP * K + K * M + CP * M),
    )

    out = pl.pallas_call(
        _conv_split_kernel,
        out_shape=jax.ShapeDtypeStruct((CP, M), x_nchw.dtype),
        in_specs=[
            pl.BlockSpec(memory_space=pltpu.MemorySpace.VMEM),
            pl.BlockSpec(memory_space=pltpu.MemorySpace.VMEM),
        ],
        out_specs=pl.BlockSpec(memory_space=pltpu.MemorySpace.VMEM),
        cost_estimate=cost,
    )(w_lhs, rhs)

    # Free row-major view: row c of the slab is channel c in (n, h, w) order.
    y = out.reshape(CP, N, 1, H, W)
    return y[0], y[1]                                            # each (N, 1, H, W)


def layer_split_forward(x, weight, bias):
    """LayerSplitModule.forward with the conv model lowered to Pallas."""
    return conv2d_split_pallas(x, weight, bias)


if __name__ == "__main__":
    key = jax.random.PRNGKey(0)
    kx, kw, kb = jax.random.split(key, 3)

    N, Cin, H, W = 2, 4, 16, 16
    Cout, Kh, Kw = 8, 3, 3

    x = jax.random.normal(kx, (N, Cin, H, W), dtype=jnp.float32)
    weight = jax.random.normal(kw, (Cout, Cin, Kh, Kw), dtype=jnp.float32) * 0.1
    bias = jax.random.normal(kb, (Cout,), dtype=jnp.float32) * 0.1

    out0, out1 = jax.jit(layer_split_forward)(x, weight, bias)
    jax.block_until_ready((out0, out1))

    # Reference check against the XLA conv (high precision on both sides).
    y_ref = lax.conv_general_dilated(
        x, weight, window_strides=(1, 1), padding="SAME",
        dimension_numbers=("NCHW", "OIHW", "NCHW"),
        precision=lax.Precision.HIGHEST) + bias.reshape(1, Cout, 1, 1)
    np.testing.assert_allclose(np.asarray(out0), np.asarray(y_ref[:, 0:1]),
                               rtol=1e-4, atol=1e-4)
    np.testing.assert_allclose(np.asarray(out1), np.asarray(y_ref[:, 1:2]),
                               rtol=1e-4, atol=1e-4)
    assert out0.shape == (N, 1, H, W) and out1.shape == (N, 1, H, W)

    print("KERNEL_OK")
</pallas_src>

<mosaic_0001>
module attributes {stable_mosaic.version = 11 : i64} {
  func.func @_conv_split_kernel(%arg0: memref<8x37xf32, #tpu.memory_space<vmem>>, %arg1: memref<37x512xf32, #tpu.memory_space<vmem>>, %arg2: memref<8x512xf32, #tpu.memory_space<vmem>>) attributes {dimension_semantics = [], scalar_prefetch = 0 : i64, scratch_operands = 0 : i64, tpu.core_type = #tpu.core_type<tc>} {
    %c0 = arith.constant 0 : index
    %c0_0 = arith.constant 0 : index
    %0 = vector.load %arg0[%c0, %c0_0] : memref<8x37xf32, #tpu.memory_space<vmem>>, vector<8x37xf32>
    %c0_1 = arith.constant 0 : index
    %c0_2 = arith.constant 0 : index
    %1 = vector.load %arg1[%c0_1, %c0_2] : memref<37x512xf32, #tpu.memory_space<vmem>>, vector<37x512xf32>
    %cst = arith.constant dense<0.000000e+00> : vector<8x512xf32>
    %2 = tpu.matmul %0, %1, %cst {dimension_numbers = #tpu.dot_dimension_numbers<[1], [0], [0], [1], [0, 0, 1, 1], [], []>, precision = #tpu.contract_precision<fp32>} : vector<8x37xf32>, vector<37x512xf32>, vector<8x512xf32> -> vector<8x512xf32>
    %c0_3 = arith.constant 0 : index
    %c0_4 = arith.constant 0 : index
    %3 = vector.load %arg2[%c0_3, %c0_4] : memref<8x512xf32, #tpu.memory_space<vmem>>, vector<8x512xf32>
    tpu.vector_store %arg2[%c0_3, %c0_4], %2 {strides = array<i32>} : memref<8x512xf32, #tpu.memory_space<vmem>>, vector<8x512xf32>,
    return
  }
}

</mosaic_0001>

<bundles_post_ra>
// kernel: squeeze.2
= control target key start
LH: loop header
LB: loop body
LE: loop exit
PB: predicated region body
PF: predicated region fallthrough
CT: control target
= control target key end

     0   :  { %s135_s0 = inlined_call_operand.vmem [shape: f32[512], index: 0, kind: input, shape index: {}]   ;;  %s136_s1 = inlined_call_operand.hbm [shape: f32[2,1,16,16], index: 1, kind: output, shape index: {}]  }
   0x1   :  { %v5_v0 = vld [vmem:[%s135_s0] sm:$0xf] }
   0x2   :  { %6 = vst [vmem:[#allocation2] sm:$0xf] %v5_v0 }
   0x3   :  { %2 = vsyncpa [#allocation1], 0  ;;  %s94_s0 = smov 112   ;;  %s95_s8 = smov 80   ;;  %vm8_vm0 = vcmask 130048  }
   0x4   :  { %s96_s9 = smov 96   ;;  %s97_s10 = smov 64  }
   0x5   :  { %s98_s11 = smov 48   ;;  %s99_s12 = smov 32  }
   0x6   :  { %s100_s13 = smov 16   ;;  %s101_s14 = smov [#allocation0]  }
   0x7   :  { %s56_s15 = sshll.u32 %s101_s14, 4  ;;  %s57_s15 = int_to_ptr.vmem [resolvable:$true] %s56_s15 }
   0x8   :  { %s70_s16 = scalar_lea.vmem %s57_s15, 512  ;;  %p75_p1 = scmp.lt.s32.totalorder %s57_s15, %s57_s15 }
   0x9   :  { %v10_v1 = vld [vmem:[#allocation2] sm:$0xf]   ;;  %p71_p0 = scmp.ne.s32.totalorder %s57_s15, %s70_s16  ;;  %p76_p2 = scmp.lt.s32.totalorder %s70_s16, %s70_s16 }
   0xa   :  { %v22_v2 = vld [vmem:[#allocation2] sm:$0xf]   ;;  %11 = vrot.lane.b32.xlu0 %v10_v1, %s94_s0 }
   0xb   :  { %23 = vrot.lane.b32.xlu1 %v22_v2, %s95_s8  ;;  %v16_v3 = vld [vmem:[#allocation2] sm:$0xf]   ;;  %p77_p3 = por %p76_p2, %p75_p1 }
   0xc   :  { %v28_v4 = vld [vmem:[#allocation2] sm:$0xf]  }
   0xd   :  { %v7_v5 = vld [vmem:[#allocation2] sm:$0xf]   ;;  %p78_p4 = pnand %p77_p3, %p71_p0 }
   0xe   :  { %9 = vst.msk [vmem:[#allocation0] ss:$8 sm:$0xf] %vm8_vm0, %v7_v5   ;;  %17 = vrot.lane.b32.xlu0 %v16_v3, %s96_s9  ;;  %v34_v6 = vld [vmem:[#allocation2] sm:$0xf]  }
   0xf   :  { %29 = vrot.lane.b32.xlu1 %v28_v4, %s97_s10  ;;  %v40_v7 = vld [vmem:[#allocation2] sm:$0xf]  }
  0x10   :  { %v46_v8 = vld [vmem:[#allocation2] sm:$0xf]  }
  0x12   :  { %35 = vrot.lane.b32.xlu0 %v34_v6, %s98_s11 }
  0x13   :  { %41 = vrot.lane.b32.xlu1 %v40_v7, %s99_s12 }
  0x16   :  { %47 = vrot.lane.b32.xlu0 %v46_v8, %s100_s13 }
  0x7c   :  { %v12_v9 = vpop.permute.xlu0 %11  }
  0x7d   :  { %v24_v10 = vpop.permute.xlu1 %23   ;;  %15 = vst.msk [vmem:[#allocation0 + $0x1] ss:$8 sm:$0xf] %vm8_vm0, %v12_v9  }
  0x7e   :  { %27 = vst.msk [vmem:[#allocation0 + $0x3] ss:$8 sm:$0xf] %vm8_vm0, %v24_v10  }
  0x80   :  { %v18_v11 = vpop.permute.xlu0 %17  }
  0x81   :  { %v30_v12 = vpop.permute.xlu1 %29   ;;  %21 = vst.msk [vmem:[#allocation0 + $0x2] ss:$8 sm:$0xf] %vm8_vm0, %v18_v11  }
  0x82   :  { %33 = vst.msk [vmem:[#allocation0 + $0x4] ss:$8 sm:$0xf] %vm8_vm0, %v30_v12  }
  0x84   :  { %v36_v13 = vpop.permute.xlu0 %35  }
  0x85   :  { %v42_v14 = vpop.permute.xlu1 %41   ;;  %39 = vst.msk [vmem:[#allocation0 + $0x5] ss:$8 sm:$0xf] %vm8_vm0, %v36_v13  }
  0x86   :  { %45 = vst.msk [vmem:[#allocation0 + $0x6] ss:$8 sm:$0xf] %vm8_vm0, %v42_v14  }
  0x88   :  { %v48_v15 = vpop.permute.xlu0 %47  }
  0x89   :  { %51 = vst.msk [vmem:[#allocation0 + $0x7] ss:$8 sm:$0xf] %vm8_vm0, %v48_v15  }
  0x8a   :  { %81 = shalt.err (!%p78_p4)
}
  0x8b   :  { %s82_s19 = scalar_lea.hbm %s136_s1, 512 }
  0x8c   :  { %p83_p5 = scmp.ne.s32.totalorder %s136_s1, %s82_s19  ;;  %p86_p6 = scmp.lt.u32.totalorder %s82_s19, %s136_s1 }
  0x8e   :  { %p88_p7 = pnand %p86_p6, %p83_p5 }
  0x90   :  { %91 = shalt.err (!%p88_p7)
}
  0x91   :  { %59 = dma.vmem_to_hbm [thread:$0]  %s57_s15, 512, %s136_s1, [#allocation1]  }
  0x92   :  { %92 = dma.done.wait [#allocation1], 512  }
  0x93   :  { %93 = vsyncadd [#allocation1], 4294966784 }
  0x94   :  { %61 = vsyncpa [#allocation1], 1 }

// kernel: layer_split_forward.1
= control target key start
LH: loop header
LB: loop body
LE: loop exit
PB: predicated region body
PF: predicated region fallthrough
CT: control target
= control target key end

     0   :  { %vm36_vm0 = vcmask 1044480   ;;  %v1312_v3 = vmov 0.0   ;;  %vm32_vm1 = vcmask 302080   ;;  %s1692_s1 = inlined_call_operand.vmem [shape: f32[37,512], index: 1, kind: input, shape index: {}]   ;;  %s1693_s0 = inlined_call_operand.vmem [shape: f32[8,37], index: 0, kind: input, shape index: {}]   ;;  %s1694_s2 = inlined_call_operand.vmem [shape: f32[8,512], index: 2, kind: output, shape index: {}]  }
   0x1   :  { %v13_v0 = vld [vmem:[%s1692_s1 + $0x8] sm:$0xff]  ;;  %v15_v2 = vld [vmem:[%s1692_s1 + $0x18] sm:$0xff]  ;;  %123 = vmatprep.mubr.f32.mxu0 %v1312_v3  ;;  %692 = vmatprep.mubr.f32.mxu1 %v1312_v3  ;;  %v12_v8 = vld [vmem:[%s1692_s1] sm:$0xff] }
   0x2   :  { %v17_v1 = vld [vmem:[%s1692_s1 + $0x28] sm:$0xff]  ;;  %v49_v4 = vand.u32 4294901760, %v13_v0  ;;  %v19_v6 = vld [vmem:[%s1692_s1 + $0x38] sm:$0xff]  ;;  %v618_v7 = vand.u32 4294901760, %v15_v2  ;;  %v16_v9 = vld [vmem:[%s1692_s1 + $0x20] sm:$0xff]  ;;  %v51_v11 = vand.u32 4294901760, %v12_v8 }
   0x3   :  { %v53_v5 = vand.u32 4294901760, %v17_v1  ;;  %v622_v10 = vand.u32 4294901760, %v19_v6  ;;  %v55_v12 = vand.u32 4294901760, %v16_v9  ;;  %v14_v13 = vld [vmem:[%s1692_s1 + $0x10] sm:$0xff]  ;;  %v21_v15 = vld [vmem:[%s1692_s1 + $0x48] sm:$0xff]  ;;  %v23_v21 = vld [vmem:[%s1692_s1 + $0x58] sm:$0xff] }
   0x4   :  { %v18_v14 = vld [vmem:[%s1692_s1 + $0x30] sm:$0xff]  ;;  %v1359_v17 = vsub.f32 %v13_v0, %v49_v4  ;;  %v1363_v19 = vsub.f32 %v15_v2, %v618_v7  ;;  %v25_v20 = vld [vmem:[%s1692_s1 + $0x68] sm:$0xff]  ;;  %v27_v22 = vld [vmem:[%s1692_s1 + $0x78] sm:$0xff]  ;;  %v1380_v26 = vsub.f32 %v12_v8, %v51_v11  ;;  %v620_v29 = vand.u32 4294901760, %v14_v13 }
   0x5   :  { %v1357_v16 = vpack.c.bf16 %v53_v5, %v49_v4  ;;  %v1361_v18 = vsub.f32 %v17_v1, %v53_v5  ;;  %v1374_v23 = vpack.c.bf16 %v622_v10, %v618_v7  ;;  %v1376_v24 = vsub.f32 %v19_v6, %v622_v10  ;;  %v20_v27 = vld [vmem:[%s1692_s1 + $0x40] sm:$0xff]  ;;  %v22_v37 = vld [vmem:[%s1692_s1 + $0x50] sm:$0xff]  ;;  %v29_v43 = vld [vmem:[%s1692_s1 + $0x88] sm:$0x1f] }
   0x6   :  { %v1378_v25 = vpack.c.bf16 %v55_v12, %v51_v11  ;;  %v1386_v28 = vsub.f32 %v16_v9, %v55_v12  ;;  %v624_v30 = vand.u32 4294901760, %v18_v14  ;;  %v57_v31 = vand.u32 4294901760, %v21_v15  ;;  %v24_v32 = vld [vmem:[%s1692_s1 + $0x60] sm:$0xff]  ;;  %v26_v38 = vld [vmem:[%s1692_s1 + $0x70] sm:$0xff]  ;;  %v31_v44 = vld [vmem:[%s1692_s1 + $0x98] sm:$0x1f] }
   0x7   :  { %1196 = vmatprep.subr.bf16.mxu0 %v1357_v16  ;;  %1244 = vmatprep.subr.bf16.mxu1 %v1374_v23  ;;  %v61_v33 = vand.u32 4294901760, %v25_v20  ;;  %v626_v34 = vand.u32 4294901760, %v23_v21  ;;  %v630_v35 = vand.u32 4294901760, %v27_v22  ;;  %v59_v36 = vand.u32 4294901760, %v20_v27  ;;  %v28_v45 = vld [vmem:[%s1692_s1 + $0x80] sm:$0x1f] }
   0x8   :  { %1198 = vmatpush1.bf16.msra.mxu0 %v1378_v25  ;;  %v1399_v39 = vpack.c.bf16 %v624_v30, %v620_v29  ;;  %v1401_v40 = vsub.f32 %v14_v13, %v620_v29  ;;  %v1403_v41 = vsub.f32 %v18_v14, %v624_v30  ;;  %v1405_v42 = vsub.f32 %v21_v15, %v57_v31  ;;  %v30_v58 = vld [vmem:[%s1692_s1 + $0x90] sm:$0x1f]  ;;  %v11_v63 = vld [vmem:[%s1693_s0] sm:$0xff] }
   0x9   :  { %v1416_v46 = vpack.c.bf16 %v61_v33, %v57_v31  ;;  %v1418_v47 = vsub.f32 %v25_v20, %v61_v33  ;;  %v1420_v48 = vpack.c.bf16 %v630_v35, %v626_v34  ;;  %v1422_v49 = vsub.f32 %v23_v21, %v626_v34 }
   0xa   :  { %1246 = vmatpush1.bf16.msra.mxu1 %v1399_v39  ;;  %v1425_v50 = vsub.f32 %v27_v22, %v630_v35  ;;  %v63_v51 = vand.u32 4294901760, %v24_v32  ;;  %v1427_v52 = vsub.f32 %v20_v27, %v59_v36  ;;  %v628_v53 = vand.u32 4294901760, %v22_v37 }
   0xb   :  { %1200 = vmatprep.subr.bf16.mxu0 %v1416_v46  ;;  %1248 = vmatprep.subr.bf16.mxu1 %v1420_v48  ;;  %v632_v54 = vand.u32 4294901760, %v26_v38  ;;  %v1432_v55 = vsel %vm36_vm0, %v29_v43, 0  ;;  %v1435_v56 = vsel %vm36_vm0, %v31_v44, 0  ;;  %v38_v57 = vsel %vm36_vm0, %v28_v45, 0 }
   0xc   :  { %v1441_v59 = vpack.c.bf16 %v63_v51, %v59_v36  ;;  %v1443_v60 = vsub.f32 %v24_v32, %v63_v51  ;;  %v1445_v61 = vsub.f32 %v22_v37, %v628_v53  ;;  %v1448_v62 = vand.u32 4294901760, %v1432_v55 }
   0xd   :  { %v1453_v0 = vpack.c.bf16 %v632_v54, %v628_v53  ;;  %v1455_v1 = vsub.f32 %v26_v38, %v632_v54  ;;  %v1458_v2 = vand.u32 4294901760, %v1435_v56  ;;  %v1460_v4 = vand.u32 4294901760, %v38_v57 }
   0xe   :  { %1202 = vmatpush1.bf16.msra.mxu0 %v1441_v59  ;;  %v44_v5 = vsel %vm36_vm0, %v30_v58, 0  ;;  %v137_v6 = vand.u32 4294901760, %v1359_v17  ;;  %v149_v7 = vand.u32 4294901760, %v1361_v18  ;;  %v706_v8 = vand.u32 4294901760, %v1363_v19 }
   0xf   :  { %1250 = vmatpush1.bf16.msra.mxu1 %v1453_v0  ;;  %66 = vmatprep.subr.mxu0 %v1448_v62  ;;  %v1470_v9 = vsub.f32 %v38_v57, %v1460_v4  ;;  %v1472_v10 = vand.u32 4294901760, %v44_v5  ;;  %v718_v11 = vand.u32 4294901760, %v1376_v24  ;;  %v34_v12 = vsel %vm32_vm1, %v11_v63, 0 }
  0x10   :  { %635 = vmatprep.subr.mxu1 %v1458_v2  ;;  %v138_v13 = vsub.f32 %v1359_v17, %v137_v6  ;;  %v150_v14 = vsub.f32 %v1361_v18, %v149_v7  ;;  %v707_v15 = vsub.f32 %v1363_v19, %v706_v8  ;;  %v1486_v20 = vand.u32 4294901760, %v34_v12 }
  0x11   :  { %v1489_v21 = vsub.f32 %v44_v5, %v1472_v10  ;;  %v719_v22 = vsub.f32 %v1376_v24, %v718_v11  ;;  %v143_v27 = vand.u32 4294901760, %v1380_v26  ;;  %v155_v29 = vand.u32 4294901760, %v1386_v28 }
  0x12   :  { %68 = vmatpush1.msra.mxu0 %v1460_v4  ;;  %v139_v30 = vand.u32 4294901760, %v138_v13  ;;  %v151_v31 = vand.u32 4294901760, %v150_v14  ;;  %v708_v32 = vand.u32 4294901760, %v707_v15  ;;  %v1498_v33 = vsub.f32 %v34_v12, %v1486_v20 }
  0x13   :  { %637 = vmatpush1.msra.mxu1 %v1472_v10  ;;  %v720_v34 = vand.u32 4294901760, %v719_v22  ;;  %v144_v35 = vsub.f32 %v1380_v26, %v143_v27  ;;  %v156_v36 = vsub.f32 %v1386_v28, %v155_v29  ;;  %v712_v37 = vand.u32 4294901760, %v1401_v40 }
  0x14   :  { %v1203_v38 = vpack.c.bf16 %v151_v31, %v139_v30  ;;  %v1509_v43 = vand.u32 4294901760, %v1498_v33  ;;  %v724_v44 = vand.u32 4294901760, %v1403_v41  ;;  %v161_v45 = vand.u32 4294901760, %v1405_v42 }
  0x15   :  { %v1251_v51 = vpack.c.bf16 %v720_v34, %v708_v32  ;;  %v145_v53 = vand.u32 4294901760, %v144_v35  ;;  %v157_v54 = vand.u32 4294901760, %v156_v36  ;;  %v713_v57 = vsub.f32 %v1401_v40, %v712_v37 }
  0x16   :  { %1204 = vmatprep.subr.bf16.mxu0 %v1203_v38  ;;  %v127_v58 = vsub.f32 %v1498_v33, %v1509_v43  ;;  %v725_v63 = vsub.f32 %v1403_v41, %v724_v44  ;;  %v162_v5 = vsub.f32 %v1405_v42, %v161_v45  ;;  %v173_v12 = vand.u32 4294901760, %v1418_v47 }
  0x17   :  { %1252 = vmatprep.subr.bf16.mxu1 %v1251_v51  ;;  %v1205_v13 = vpack.c.bf16 %v157_v54, %v145_v53  ;;  %v714_v14 = vand.u32 4294901760, %v713_v57  ;;  %v1695_v15 = vand.u32 4294901760, %v1422_v49  ;;  %v1696_v22 = vand.u32 4294901760, %v1425_v50 }
  0x18   :  { %v128_v30 = vand.u32 4294901760, %v127_v58  ;;  %v726_v31 = vand.u32 4294901760, %v725_v63  ;;  %v163_v32 = vand.u32 4294901760, %v162_v5  ;;  %v174_v34 = vsub.f32 %v1418_v47, %v173_v12 }
  0x19   :  { %v731_v35 = vsub.f32 %v1422_v49, %v1695_v15  ;;  %v743_v36 = vsub.f32 %v1425_v50, %v1696_v22  ;;  %v167_v38 = vand.u32 4294901760, %v1427_v52  ;;  %v1697_v51 = vand.u32 4294901760, %v1443_v60 }
  0x1a   :  { %129 = vmatmul.mubr.f32.vlgmr.msra.gmra.mrb[0].mxu0 %v128_v30  ;;  %698 = vmatmul.mubr.f32.vlgmr.msra.gmra.mrb[0].mxu1 %v128_v30  ;;  %v1253_v53 = vpack.c.bf16 %v726_v31, %v714_v14  ;;  %v175_v54 = vand.u32 4294901760, %v174_v34  ;;  %v1699_v57 = vand.u32 4294901760, %v1445_v61  ;;  %v1698_v58 = vand.u32 4294901760, %v1455_v1 }
  0x1b   :  { %1206 = vmatpush1.bf16.msra.mxu0 %v1205_v13  ;;  %v732_v63 = vand.u32 4294901760, %v731_v35  ;;  %v744_v5 = vand.u32 4294901760, %v743_v36  ;;  %v168_v15 = vsub.f32 %v1427_v52, %v167_v38  ;;  %v180_v22 = vsub.f32 %v1443_v60, %v1697_v51  ;;  %249 = vmatprep.mubr.f32.mxu0 %v1312_v3 }
  0x1c   :  { %1254 = vmatpush1.bf16.msra.mxu1 %v1253_v53  ;;  %v1207_v14 = vpack.c.bf16 %v175_v54, %v163_v32  ;;  %v737_v30 = vsub.f32 %v1445_v61, %v1699_v57  ;;  %v749_v13 = vsub.f32 %v1455_v1, %v1698_v58  ;;  %v1555_v31 = vsub.f32 %v1432_v55, %v1448_v62 }
  0x1d   :  { %v1255_v34 = vpack.c.bf16 %v744_v5, %v732_v63  ;;  %v169_v35 = vand.u32 4294901760, %v168_v15  ;;  %v181_v36 = vand.u32 4294901760, %v180_v22  ;;  %v1559_v51 = vsub.f32 %v1435_v56, %v1458_v2  ;;  %818 = vmatprep.mubr.f32.mxu1 %v1312_v3 }
  0x1e   :  { %1208 = vmatprep.subr.bf16.mxu0 %v1207_v14  ;;  %v738_v32 = vand.u32 4294901760, %v737_v30  ;;  %v750_v53 = vand.u32 4294901760, %v749_v13  ;;  %v185_v54 = vand.u32 4294901760, %v1555_v31  ;;  %v191_v58 = vand.u32 4294901760, %v1470_v9 }
  0x1f   :  { %1256 = vmatprep.subr.bf16.mxu1 %v1255_v34  ;;  %v1209_v57 = vpack.c.bf16 %v181_v36, %v169_v35  ;;  %v754_v55 = vand.u32 4294901760, %v1559_v51  ;;  %v760_v15 = vand.u32 4294901760, %v1489_v21  ;;  %v1211_v34 = vpack.c.bf16 %v1361_v18, %v1359_v17 }
  0x20   :  { %v1257_v22 = vpack.c.bf16 %v750_v53, %v738_v32  ;;  %v186_v56 = vsub.f32 %v1555_v31, %v185_v54  ;;  %v192_v63 = vsub.f32 %v1470_v9, %v191_v58  ;;  %v1259_v32 = vpack.c.bf16 %v1376_v24, %v1363_v19 }
  0x21   :  { %1210 = vmatpush1.bf16.msra.mxu0 %v1209_v57  ;;  %v755_v5 = vsub.f32 %v1559_v51, %v754_v55  ;;  %v761_v14 = vsub.f32 %v1489_v21, %v760_v15  ;;  %v1213_v57 = vpack.c.bf16 %v1386_v28, %v1380_v26  ;;  %v1261_v53 = vpack.c.bf16 %v1403_v41, %v1401_v40 }
  0x22   :  { %1258 = vmatpush1.bf16.msra.mxu1 %v1257_v22  ;;  %v187_v30 = vand.u32 4294901760, %v186_v56  ;;  %v193_v13 = vand.u32 4294901760, %v192_v63  ;;  %v1215_v22 = vpack.c.bf16 %v1418_v47, %v1405_v42  ;;  %v1263_v56 = vpack.c.bf16 %v1425_v50, %v1422_v49 }
  0x23   :  { %v756_v35 = vand.u32 4294901760, %v755_v5  ;;  %v762_v36 = vand.u32 4294901760, %v761_v14  ;;  %v1217_v63 = vpack.c.bf16 %v1443_v60, %v1427_v52  ;;  %v1265_v5 = vpack.c.bf16 %v1455_v1, %v1445_v61 }
  0x24   :  { %188 = vmatprep.subr.mxu0 %v187_v30  ;;  %v1275_v14 = vpack.c.bf16 %v718_v11, %v706_v8  ;;  %v1229_v30 = vpack.c.bf16 %v155_v29, %v143_v27  ;;  %v1277_v17 = vpack.c.bf16 %v724_v44, %v712_v37  ;;  %v1231_v18 = vpack.c.bf16 %v173_v12, %v161_v45 }
  0x25   :  { %757 = vmatprep.subr.mxu1 %v756_v35  ;;  %194 = vmatpush1.msra.mxu0 %v193_v13  ;;  %v1700_v19 = vand.u32 4294901760, %v1422_v49  ;;  %v1701_v24 = vand.u32 4294901760, %v1425_v50  ;;  %v1702_v28 = vand.u32 4294901760, %v1443_v60  ;;  %v1703_v41 = vand.u32 4294901760, %v1445_v61 }
  0x26   :  { %763 = vmatpush1.msra.mxu1 %v762_v36  ;;  %1212 = vmatprep.subr.bf16.mxu0 %v1211_v34  ;;  %v1704_v42 = vand.u32 4294901760, %v1455_v1 }
  0x27   :  { %1260 = vmatprep.subr.bf16.mxu1 %v1259_v32  ;;  %251 = vmatmul.mubr.f32.vlgmr.msra.gmra.mrb[0].mxu0 %v1486_v20  ;;  %v1279_v26 = vpack.c.bf16 %v1701_v24, %v1700_v19  ;;  %v1233_v40 = vpack.c.bf16 %v1702_v28, %v167_v38 }
  0x28   :  { %1214 = vmatpush1.bf16.msra.mxu0 %v1213_v57  ;;  %820 = vmatmul.mubr.f32.vlgmr.msra.gmra.mrb[0].mxu1 %v1486_v20  ;;  %v1281_v47 = vpack.c.bf16 %v1704_v42, %v1703_v41 }
  0x29   :  { %1262 = vmatpush1.bf16.msra.mxu1 %v1261_v53  ;;  %1216 = vmatprep.subr.bf16.mxu0 %v1215_v22 }
  0x2a   :  { %1264 = vmatprep.subr.bf16.mxu1 %v1263_v56  ;;  %341 = vmatprep.mubr.f32.mxu0 %v1312_v3 }
  0x2b   :  { %910 = vmatprep.mubr.f32.mxu1 %v1312_v3 }
  0x2c   :  { %1218 = vmatpush1.bf16.msra.mxu0 %v1217_v63 }
  0x2d   :  { %1266 = vmatpush1.bf16.msra.mxu1 %v1265_v5  ;;  %283 = vmatprep.subr.mxu0 %v1555_v31 }
  0x2e   :  { %852 = vmatprep.subr.mxu1 %v1559_v51 }
  0x30   :  { %286 = vmatpush1.msra.mxu0 %v1470_v9 }
  0x31   :  { %855 = vmatpush1.msra.mxu1 %v1489_v21  ;;  %1220 = vmatprep.subr.bf16.mxu0 %v1357_v16 }
  0x32   :  { %1268 = vmatprep.subr.bf16.mxu1 %v1374_v23  ;;  %344 = vmatmul.mubr.f32.vlgmr.msra.gmra.mrb[0].mxu0 %v1498_v33 }
  0x33   :  { %1222 = vmatpush1.bf16.msra.mxu0 %v1378_v25  ;;  %913 = vmatmul.mubr.f32.vlgmr.msra.gmra.mrb[0].mxu1 %v1498_v33  ;;  %v1227_v33 = vpack.c.bf16 %v149_v7, %v137_v6 }
  0x34   :  { %1270 = vmatpush1.bf16.msra.mxu1 %v1399_v39  ;;  %1224 = vmatprep.subr.bf16.mxu0 %v1416_v46 }
  0x35   :  { %1272 = vmatprep.subr.bf16.mxu1 %v1420_v48  ;;  %424 = vmatprep.mubr.f32.mxu0 %v1312_v3 }
  0x36   :  { %993 = vmatprep.mubr.f32.mxu1 %v1312_v3 }
  0x37   :  { %1226 = vmatpush1.bf16.msra.mxu0 %v1441_v59 }
  0x38   :  { %1274 = vmatpush1.bf16.msra.mxu1 %v1453_v0  ;;  %367 = vmatprep.subr.mxu0 %v1448_v62 }
  0x39   :  { %936 = vmatprep.subr.mxu1 %v1458_v2 }
  0x3b   :  { %369 = vmatpush1.msra.mxu0 %v1460_v4 }
  0x3c   :  { %938 = vmatpush1.msra.mxu1 %v1472_v10  ;;  %1228 = vmatprep.subr.bf16.mxu0 %v1227_v33 }
  0x3d   :  { %1276 = vmatprep.subr.bf16.mxu1 %v1275_v14  ;;  %428 = vmatmul.mubr.f32.vlgmr.msra.gmra.mrb[0].mxu0 %v1509_v43 }
  0x3e   :  { %1230 = vmatpush1.bf16.msra.mxu0 %v1229_v30  ;;  %997 = vmatmul.mubr.f32.vlgmr.msra.gmra.mrb[0].mxu1 %v1509_v43 }
  0x3f   :  { %1278 = vmatpush1.bf16.msra.mxu1 %v1277_v17  ;;  %1232 = vmatprep.subr.bf16.mxu0 %v1231_v18 }
  0x40   :  { %1280 = vmatprep.subr.bf16.mxu1 %v1279_v26  ;;  %528 = vmatprep.mubr.f32.mxu0 %v1312_v3 }
  0x41   :  { %1097 = vmatprep.mubr.f32.mxu1 %v1312_v3 }
  0x42   :  { %1234 = vmatpush1.bf16.msra.mxu0 %v1233_v40 }
  0x43   :  { %1282 = vmatpush1.bf16.msra.mxu1 %v1281_v47  ;;  %469 = vmatprep.subr.mxu0 %v185_v54 }
  0x44   :  { %1038 = vmatprep.subr.mxu1 %v754_v55 }
  0x46   :  { %473 = vmatpush1.msra.mxu0 %v191_v58 }
  0x47   :  { %1042 = vmatpush1.msra.mxu1 %v760_v15  ;;  %1236 = vmatprep.subr.bf16.mxu0 %v1357_v16 }
  0x48   :  { %1284 = vmatprep.subr.bf16.mxu1 %v1374_v23  ;;  %530 = vmatmul.mubr.f32.vlgmr.msra.gmra.mrb[0].mxu0 %v1486_v20 }
  0x49   :  { %1238 = vmatpush1.bf16.msra.mxu0 %v1378_v25  ;;  %1099 = vmatmul.mubr.f32.vlgmr.msra.gmra.mrb[0].mxu1 %v1486_v20 }
  0x4a   :  { %1286 = vmatpush1.bf16.msra.mxu1 %v1399_v39  ;;  %1240 = vmatprep.subr.bf16.mxu0 %v1416_v46 }
  0x4b   :  { %1288 = vmatprep.subr.bf16.mxu1 %v1420_v48  ;;  %610 = vmatprep.mubr.f32.mxu0 %v1312_v3 }
  0x4c   :  { %1179 = vmatprep.mubr.f32.mxu1 %v1312_v3 }
  0x4d   :  { %1242 = vmatpush1.bf16.msra.mxu0 %v1441_v59 }
  0x4e   :  { %1290 = vmatpush1.bf16.msra.mxu1 %v1453_v0  ;;  %553 = vmatprep.subr.mxu0 %v1448_v62 }
  0x4f   :  { %1122 = vmatprep.subr.mxu1 %v1458_v2 }
  0x51   :  { %555 = vmatpush1.msra.mxu0 %v1460_v4 }
  0x52   :  { %1124 = vmatpush1.msra.mxu1 %v1472_v10  ;;  %612 = vmatmul.mubr.f32.vlgmr.msra.gmra.mrb[0].mxu0 %v1486_v20 }
  0x53   :  { %1181 = vmatmul.mubr.f32.vlgmr.msra.gmra.mrb[0].mxu1 %v1486_v20 }
 0x125   :  { %v613_v16 = vpop.f32.mrb[0].mxu0 }
 0x126   :  { %1187 = vst [vmem:[%s1694_s2] sm:$0xff] %v613_v16  ;;  %v1182_v3 = vpop.f32.mrb[0].mxu1  ;;  %v615_v23 = vpop.f32.mrb[1].mxu0 }
 0x127   :  { %1189 = vst [vmem:[%s1694_s2 + $0x10] sm:$0xff] %v1182_v3  ;;  %1188 = vst [vmem:[%s1694_s2 + $0x8] sm:$0xff] %v615_v23  ;;  %v1184_v25 = vpop.f32.mrb[1].mxu1 }
 0x128   :  { %1190 = vst [vmem:[%s1694_s2 + $0x18] sm:$0xff] %v1184_v25 }

</bundles_post_ra>
